<compile_context>
chip_gen: v5e
topology: v5e:2x2
jax: 0.10.0
libtpu: 0.0.40
codegen_flags: <defaults>
</compile_context>

<pallas_src>
import jax
import jax.numpy as jnp
from jax.experimental import pallas as pl
from jax.experimental.pallas import tpu as pltpu


def _tri_conv1x1_kernel(v_ref, w_ref, x_ref, wv_ref, ww_ref, wx_ref,
                        ov_ref, ow_ref, ox_ref):
    # activations: (C, TM) lane-dense; weights: (4C, C); outputs: (4C, TM).
    # K=C is tiny so the MXU is mostly idle, but the dots are fully DMA-hidden
    # in this HBM-bandwidth-bound op.
    ov_ref[...] = jnp.dot(wv_ref[...], v_ref[...],
                          preferred_element_type=jnp.float32).astype(ov_ref.dtype)
    ow_ref[...] = jnp.dot(ww_ref[...], w_ref[...],
                          preferred_element_type=jnp.float32).astype(ow_ref.dtype)
    ox_ref[...] = jnp.dot(wx_ref[...], x_ref[...],
                          preferred_element_type=jnp.float32).astype(ox_ref.dtype)


def _vmem_capacity_bytes():
    """Physical VMEM of the local chip; conservative (v7x) fallback."""
    try:
        return int(pltpu.get_tpu_info().vmem_capacity_bytes)
    except Exception:
        return 64 * 1024 * 1024


def _pick_tm(hw, n_batch, c_in, c_out, in_itemsize, out_itemsize,
             tile_budget_bytes, cap_cols=16384):
    """Pixel-tile width: as large as the VMEM budget allows (multiple of 128,
    or the full row), capped at cap_cols, with >=2 grid steps when legal."""
    # 3 branches x (activation + conv output) columns, double-buffered.
    bytes_per_col = 3 * 2 * (c_in * in_itemsize + c_out * out_itemsize)
    limit = max(128, tile_budget_bytes // max(1, bytes_per_col))
    limit = min(limit, cap_cols)
    limit = (limit // 128) * 128

    if hw <= limit:
        tm = hw                      # one full-row tile (block == full extent)
    else:
        tm = limit                   # multiple of 128; ragged last block is OK

    # v7x megacore: make sure the "parallel" grid has >=2 steps when we can
    # split legally (split block must stay a multiple of 128).
    if n_batch * pl.cdiv(hw, tm) < 2:
        half = ((pl.cdiv(hw, 2) + 127) // 128) * 128
        if half < hw:
            tm = half
    return tm


def _pixel_shuffle_from_flat(y_flat, n, c, h, w, r=2):
    """y_flat: (N, r*r*C, H*W) conv output in NCHW order -> (N, C, r*H, r*W)."""
    y = y_flat.reshape(n, c, r, r, h, w)
    y = jnp.transpose(y, (0, 1, 4, 2, 5, 3))     # (N, C, H, r, W, r)
    return y.reshape(n, c, h * r, w * r)


def tri_ups_forward(v, w, x, params, out_dtype=None):
    """triUps forward: three independent (Conv2d 1x1, bias=False) -> PixelShuffle(2).

    v, w, x: (N, chals, H, W);  params: 3 weights of shape (4*chals, chals, 1, 1).
    out_dtype: optional narrower output dtype (e.g. jnp.bfloat16) to cut write
               traffic; defaults to the input dtype (exact reference numerics).
    Returns three (N, chals, 2H, 2W) arrays.
    """
    wv, ww, wx = params
    n, c, h, wd = v.shape
    cout = wv.shape[0]
    hw = h * wd
    out_dtype = v.dtype if out_dtype is None else out_dtype
    in_itemsize = jnp.dtype(v.dtype).itemsize
    out_itemsize = jnp.dtype(out_dtype).itemsize

    # Free reshapes only (no HBM transpose pass).
    v2 = v.reshape(n, c, hw)
    w2 = w.reshape(n, c, hw)
    x2 = x.reshape(n, c, hw)
    wvm = wv.reshape(cout, c)
    wwm = ww.reshape(cout, c)
    wxm = wx.reshape(cout, c)

    # Generation-aware budgets: ~24 MiB of tiles on v7x (64 MiB VMEM),
    # ~48 MiB on v5e/v6e (128 MiB VMEM).
    vmem_cap = _vmem_capacity_bytes()
    tile_budget = (vmem_cap * 3) // 8
    tm = _pick_tm(hw, n, c, cout, in_itemsize, out_itemsize, tile_budget)
    n_m = pl.cdiv(hw, tm)

    # Explicit scoped-VMEM limit sized from the real footprint (double-buffered
    # tiles + resident weights + Mosaic scratch headroom), so the per-generation
    # defaults (16/32/32 MiB) never silently cap the tile growth.
    need = (3 * 2 * tm * (c * in_itemsize + cout * out_itemsize)
            + 3 * 2 * cout * c * in_itemsize
            + (4 << 20))
    vmem_limit = int(min(max(need, 32 << 20), int(vmem_cap * 0.85)))

    act_spec = pl.BlockSpec((None, c, tm), lambda i, m: (i, 0, m))
    wgt_spec = pl.BlockSpec((cout, c), lambda i, m: (0, 0))      # stays resident
    out_spec = pl.BlockSpec((None, cout, tm), lambda i, m: (i, 0, m))

    yv, yw, yx = pl.pallas_call(
        _tri_conv1x1_kernel,
        out_shape=tuple(
            jax.ShapeDtypeStruct((n, cout, hw), out_dtype) for _ in range(3)
        ),
        grid_spec=pltpu.PrefetchScalarGridSpec(
            num_scalar_prefetch=0,
            grid=(n, n_m),
            in_specs=[act_spec, act_spec, act_spec,
                      wgt_spec, wgt_spec, wgt_spec],
            out_specs=[out_spec, out_spec, out_spec],
        ),
        compiler_params=pltpu.CompilerParams(
            dimension_semantics=("parallel", "parallel"),
            vmem_limit_bytes=vmem_limit,
        ),
    )(v2, w2, x2, wvm, wwm, wxm)

    # TODO(synk): fuse this PixelShuffle into the kernel (lane-riffle blocker
    # described at the top of the file); for now it is one fused XLA
    # reshape/transpose pass, identical data movement to PyTorch PixelShuffle.
    return (
        _pixel_shuffle_from_flat(yv, n, c, h, wd),
        _pixel_shuffle_from_flat(yw, n, c, h, wd),
        _pixel_shuffle_from_flat(yx, n, c, h, wd),
    )


def _reference_branch(x_nchw, weight):
    # Pure-JAX reference: 1x1 conv (einsum over channels) + PixelShuffle(2).
    n, c, h, w = x_nchw.shape
    w_mat = weight.reshape(weight.shape[0], c)               # (4C, C)
    y = jnp.einsum("nchw,oc->nohw", x_nchw, w_mat)           # (N, 4C, H, W)
    r = 2
    y = y.reshape(n, c, r, r, h, w)
    y = jnp.transpose(y, (0, 1, 4, 2, 5, 3))
    return y.reshape(n, c, h * r, w * r)


if __name__ == "__main__":
    key = jax.random.PRNGKey(0)
    k_v, k_w, k_x, k_wv, k_ww, k_wx = jax.random.split(key, 6)

    N, chals, H, W = 2, 4, 16, 16
    v = jax.random.normal(k_v, (N, chals, H, W), dtype=jnp.float32)
    w = jax.random.normal(k_w, (N, chals, H, W), dtype=jnp.float32)
    x = jax.random.normal(k_x, (N, chals, H, W), dtype=jnp.float32)

    # Conv weights in PyTorch layout (out=4*chals, in=chals, 1, 1).
    wv = jax.random.normal(k_wv, (4 * chals, chals, 1, 1), dtype=jnp.float32) * 0.1
    ww = jax.random.normal(k_ww, (4 * chals, chals, 1, 1), dtype=jnp.float32) * 0.1
    wx = jax.random.normal(k_wx, (4 * chals, chals, 1, 1), dtype=jnp.float32) * 0.1

    outs = jax.jit(tri_ups_forward)(v, w, x, (wv, ww, wx))
    outs = jax.block_until_ready(outs)

    refs = (_reference_branch(v, wv),
            _reference_branch(w, ww),
            _reference_branch(x, wx))
    for o, r in zip(outs, refs):
        assert o.shape == (N, chals, 2 * H, 2 * W), o.shape
        assert jnp.allclose(o, r, atol=1e-5), float(jnp.max(jnp.abs(o - r)))

    print("KERNEL_OK")
</pallas_src>

<mosaic_0001>
module attributes {stable_mosaic.version = 11 : i64} {
  func.func @_tri_conv1x1_kernel(%arg0: i32, %arg1: i32, %arg2: memref<1x4x256xf32, #tpu.memory_space<vmem>>, %arg3: memref<1x4x256xf32, #tpu.memory_space<vmem>>, %arg4: memref<1x4x256xf32, #tpu.memory_space<vmem>>, %arg5: memref<16x4xf32, #tpu.memory_space<vmem>>, %arg6: memref<16x4xf32, #tpu.memory_space<vmem>>, %arg7: memref<16x4xf32, #tpu.memory_space<vmem>>, %arg8: memref<1x16x256xf32, #tpu.memory_space<vmem>>, %arg9: memref<1x16x256xf32, #tpu.memory_space<vmem>>, %arg10: memref<1x16x256xf32, #tpu.memory_space<vmem>>) attributes {dimension_semantics = [#tpu.dimension_semantics<parallel>, #tpu.dimension_semantics<parallel>], iteration_bounds = array<i64: 2, 1>, scalar_prefetch = 0 : i64, scratch_operands = 0 : i64, tpu.core_type = #tpu.core_type<tc>, window_params = [{transform_indices = @transform_0, window_bounds = array<i64: 1, 4, 256>}, {transform_indices = @transform_1, window_bounds = array<i64: 1, 4, 256>}, {transform_indices = @transform_2, window_bounds = array<i64: 1, 4, 256>}, {pipeline_mode = #tpu.pipeline_mode<synchronous>, transform_indices = @transform_3, window_bounds = array<i64: 16, 4>}, {pipeline_mode = #tpu.pipeline_mode<synchronous>, transform_indices = @transform_4, window_bounds = array<i64: 16, 4>}, {pipeline_mode = #tpu.pipeline_mode<synchronous>, transform_indices = @transform_5, window_bounds = array<i64: 16, 4>}, {transform_indices = @transform_6, window_bounds = array<i64: 1, 16, 256>}, {transform_indices = @transform_7, window_bounds = array<i64: 1, 16, 256>}, {transform_indices = @transform_8, window_bounds = array<i64: 1, 16, 256>}]} {
    %c0 = arith.constant 0 : index
    %c0_0 = arith.constant 0 : index
    %0 = vector.load %arg5[%c0, %c0_0] : memref<16x4xf32, #tpu.memory_space<vmem>>, vector<16x4xf32>
    %c0_1 = arith.constant 0 : index
    %c0_2 = arith.constant 0 : index
    %c0_3 = arith.constant 0 : index
    %1 = vector.load %arg2[%c0_1, %c0_2, %c0_3] : memref<1x4x256xf32, #tpu.memory_space<vmem>>, vector<1x4x256xf32>
    %2 = vector.shape_cast %1 : vector<1x4x256xf32> to vector<4x256xf32>
    %cst = arith.constant dense<0.000000e+00> : vector<16x256xf32>
    %3 = tpu.matmul %0, %2, %cst {dimension_numbers = #tpu.dot_dimension_numbers<[1], [0], [0], [1], [0, 0, 1, 1], [], []>} : vector<16x4xf32>, vector<4x256xf32>, vector<16x256xf32> -> vector<16x256xf32>
    %c0_4 = arith.constant 0 : index
    %c0_5 = arith.constant 0 : index
    %c0_6 = arith.constant 0 : index
    %4 = vector.load %arg8[%c0_4, %c0_5, %c0_6] : memref<1x16x256xf32, #tpu.memory_space<vmem>>, vector<1x16x256xf32>
    %5 = vector.shape_cast %4 : vector<1x16x256xf32> to vector<16x256xf32>
    %6 = vector.shape_cast %3 : vector<16x256xf32> to vector<1x16x256xf32>
    tpu.vector_store %arg8[%c0_4, %c0_5, %c0_6], %6 {strides = array<i32>} : memref<1x16x256xf32, #tpu.memory_space<vmem>>, vector<1x16x256xf32>,
    %c0_7 = arith.constant 0 : index
    %c0_8 = arith.constant 0 : index
    %7 = vector.load %arg6[%c0_7, %c0_8] : memref<16x4xf32, #tpu.memory_space<vmem>>, vector<16x4xf32>
    %c0_9 = arith.constant 0 : index
    %c0_10 = arith.constant 0 : index
    %c0_11 = arith.constant 0 : index
    %8 = vector.load %arg3[%c0_9, %c0_10, %c0_11] : memref<1x4x256xf32, #tpu.memory_space<vmem>>, vector<1x4x256xf32>
    %9 = vector.shape_cast %8 : vector<1x4x256xf32> to vector<4x256xf32>
    %cst_12 = arith.constant dense<0.000000e+00> : vector<16x256xf32>
    %10 = tpu.matmul %7, %9, %cst_12 {dimension_numbers = #tpu.dot_dimension_numbers<[1], [0], [0], [1], [0, 0, 1, 1], [], []>} : vector<16x4xf32>, vector<4x256xf32>, vector<16x256xf32> -> vector<16x256xf32>
    %c0_13 = arith.constant 0 : index
    %c0_14 = arith.constant 0 : index
    %c0_15 = arith.constant 0 : index
    %11 = vector.load %arg9[%c0_13, %c0_14, %c0_15] : memref<1x16x256xf32, #tpu.memory_space<vmem>>, vector<1x16x256xf32>
    %12 = vector.shape_cast %11 : vector<1x16x256xf32> to vector<16x256xf32>
    %13 = vector.shape_cast %10 : vector<16x256xf32> to vector<1x16x256xf32>
    tpu.vector_store %arg9[%c0_13, %c0_14, %c0_15], %13 {strides = array<i32>} : memref<1x16x256xf32, #tpu.memory_space<vmem>>, vector<1x16x256xf32>,
    %c0_16 = arith.constant 0 : index
    %c0_17 = arith.constant 0 : index
    %14 = vector.load %arg7[%c0_16, %c0_17] : memref<16x4xf32, #tpu.memory_space<vmem>>, vector<16x4xf32>
    %c0_18 = arith.constant 0 : index
    %c0_19 = arith.constant 0 : index
    %c0_20 = arith.constant 0 : index
    %15 = vector.load %arg4[%c0_18, %c0_19, %c0_20] : memref<1x4x256xf32, #tpu.memory_space<vmem>>, vector<1x4x256xf32>
    %16 = vector.shape_cast %15 : vector<1x4x256xf32> to vector<4x256xf32>
    %cst_21 = arith.constant dense<0.000000e+00> : vector<16x256xf32>
    %17 = tpu.matmul %14, %16, %cst_21 {dimension_numbers = #tpu.dot_dimension_numbers<[1], [0], [0], [1], [0, 0, 1, 1], [], []>} : vector<16x4xf32>, vector<4x256xf32>, vector<16x256xf32> -> vector<16x256xf32>
    %c0_22 = arith.constant 0 : index
    %c0_23 = arith.constant 0 : index
    %c0_24 = arith.constant 0 : index
    %18 = vector.load %arg10[%c0_22, %c0_23, %c0_24] : memref<1x16x256xf32, #tpu.memory_space<vmem>>, vector<1x16x256xf32>
    %19 = vector.shape_cast %18 : vector<1x16x256xf32> to vector<16x256xf32>
    %20 = vector.shape_cast %17 : vector<16x256xf32> to vector<1x16x256xf32>
    tpu.vector_store %arg10[%c0_22, %c0_23, %c0_24], %20 {strides = array<i32>} : memref<1x16x256xf32, #tpu.memory_space<vmem>>, vector<1x16x256xf32>,
    return
  }
  func.func @transform_0(%arg0: i32, %arg1: i32) -> (i32, i32, i32) {
    %c0_i32 = arith.constant 0 : i32
    %c0_i32_0 = arith.constant 0 : i32
    return %arg0, %c0_i32, %arg1 : i32, i32, i32
  }
  func.func @transform_1(%arg0: i32, %arg1: i32) -> (i32, i32, i32) {
    %c0_i32 = arith.constant 0 : i32
    %c0_i32_0 = arith.constant 0 : i32
    return %arg0, %c0_i32, %arg1 : i32, i32, i32
  }
  func.func @transform_2(%arg0: i32, %arg1: i32) -> (i32, i32, i32) {
    %c0_i32 = arith.constant 0 : i32
    %c0_i32_0 = arith.constant 0 : i32
    return %arg0, %c0_i32, %arg1 : i32, i32, i32
  }
  func.func @transform_3(%arg0: i32, %arg1: i32) -> (i32, i32) {
    %c0_i32 = arith.constant 0 : i32
    %c0_i32_0 = arith.constant 0 : i32
    %c0_i32_1 = arith.constant 0 : i32
    return %c0_i32, %c0_i32_0 : i32, i32
  }
  func.func @transform_4(%arg0: i32, %arg1: i32) -> (i32, i32) {
    %c0_i32 = arith.constant 0 : i32
    %c0_i32_0 = arith.constant 0 : i32
    %c0_i32_1 = arith.constant 0 : i32
    return %c0_i32, %c0_i32_0 : i32, i32
  }
  func.func @transform_5(%arg0: i32, %arg1: i32) -> (i32, i32) {
    %c0_i32 = arith.constant 0 : i32
    %c0_i32_0 = arith.constant 0 : i32
    %c0_i32_1 = arith.constant 0 : i32
    return %c0_i32, %c0_i32_0 : i32, i32
  }
  func.func @transform_6(%arg0: i32, %arg1: i32) -> (i32, i32, i32) {
    %c0_i32 = arith.constant 0 : i32
    %c0_i32_0 = arith.constant 0 : i32
    return %arg0, %c0_i32, %arg1 : i32, i32, i32
  }
  func.func @transform_7(%arg0: i32, %arg1: i32) -> (i32, i32, i32) {
    %c0_i32 = arith.constant 0 : i32
    %c0_i32_0 = arith.constant 0 : i32
    return %arg0, %c0_i32, %arg1 : i32, i32, i32
  }
  func.func @transform_8(%arg0: i32, %arg1: i32) -> (i32, i32, i32) {
    %c0_i32 = arith.constant 0 : i32
    %c0_i32_0 = arith.constant 0 : i32
    return %arg0, %c0_i32, %arg1 : i32, i32, i32
  }
}

</mosaic_0001>

<bundles_post_ra>
// kernel: tri_ups_forward.1
= control target key start
LH: loop header
LB: loop body
LE: loop exit
PB: predicated region body
PF: predicated region fallthrough
CT: control target
= control target key end

     0   :  { %s1028_s27 = smov 0   ;;  %s1030_s28 = smov 0   ;;  %s1115_s0 = inlined_call_operand.vmem [shape: f32[2,4,256], index: 0, kind: input, shape index: {}]   ;;  %s1116_s1 = inlined_call_operand.vmem [shape: f32[2,4,256], index: 1, kind: input, shape index: {}]   ;;  %s1117_s2 = inlined_call_operand.vmem [shape: f32[2,4,256], index: 2, kind: input, shape index: {}]   ;;  %s1118_s3 = inlined_call_operand.vmem [shape: f32[16,4], index: 3, kind: input, shape index: {}]   ;;  %s1119_s4 = inlined_call_operand.vmem [shape: f32[16,4], index: 4, kind: input, shape index: {}]   ;;  %s1120_s5 = inlined_call_operand.vmem [shape: f32[16,4], index: 5, kind: input, shape index: {}]   ;;  %s1121_s6 = inlined_call_operand.vmem [shape: f32[2,16,256], index: 6, kind: output, shape index: {0}]   ;;  %s1122_s7 = inlined_call_operand.vmem [shape: f32[2,16,256], index: 7, kind: output, shape index: {1}]   ;;  %s1123_s8 = inlined_call_operand.vmem [shape: f32[2,16,256], index: 8, kind: output, shape index: {2}]  }
   0x1   :  { %s1032_s29 = smov 0  }
   0x2 LB: > { %s31_s30 = sadd.s32 1, %s977_s28  ;;  %p894_p0 = scmp.ge.s32.totalorder %s981_s29, 1  ;;  %s981_s29 = sphi %s1032_s29, %s19_s29   ;;  %s977_s28 = sphi %s1030_s28, %s1125_s28   ;;  %s973_s27 = sphi %s1028_s27, %s1124_s27  }
   0x3   : > { %p33_p1 = scmp.ge.s32.totalorder %s31_s30, 2  ;;  %p326_p2 = scmp.lt.s32.totalorder %s981_s29, 3 }
   0x5   : > { %s1127_s30 = smov (%p33_p1, %s31_s30), 0  ;;  %p327_p3 = pnand %p894_p0, %p326_p2 }
   0x6   : > { %p405_p4 = scmp.lt.s32.totalorder (!%p327_p3), %s973_s27, 1 }
   0x7   : > { %330 = sbr.rel (%p327_p3) target bundleno = 178 (0xb2), region = 44 }
   0xc   : > { %s1129_s27 = smov (!%p405_p4, %s973_s27), 1  ;;  %vm478_vm0 = vcmask 1043456   ;;  %v465_v2 = vld [vmem:[%s1118_s3 + $0x8] sm:$0xff]  ;;  %vm471_vm1 = vcmask 31744   ;;  %v464_v5 = vld [vmem:[%s1118_s3] sm:$0xff] }
   0xd   : > { %s927_s9 = sshll.u32 %s1129_s27, 3  ;;  %v533_v7 = vld [vmem:[%s1119_s4] sm:$0xff]  ;;  %v534_v11 = vld [vmem:[%s1119_s4 + $0x8] sm:$0xff]  ;;  %s930_s13 = sshll.u32 %s1129_s27, 5 }
   0xe   : > { %s412_s12 = scalar_lea.vmem %s1115_s0, %s927_s9  ;;  %s422_s15 = scalar_lea.vmem %s1116_s1, %s927_s9  ;;  %v600_v10 = vld [vmem:[%s1120_s5] sm:$0xff]  ;;  %v601_v14 = vld [vmem:[%s1120_s5 + $0x8] sm:$0xff] }
   0xf   : > { %v466_v0 = vld [vmem:[%s412_s12] sm:$0xff]  ;;  %s432_s22 = scalar_lea.vmem %s1117_s2, %s927_s9  ;;  %s442_s16 = scalar_lea.vmem %s1121_s6, %s930_s13 }
  0x10   : > { %468 = vst [vmem:[#allocation1] ss:$2 sm:$0xff] %v466_v0  ;;  %v535_v1 = vld [vmem:[%s422_s15] sm:$0xff]  ;;  %s452_s19 = scalar_lea.vmem %s1122_s7, %s930_s13  ;;  %s462_s21 = scalar_lea.vmem %s1123_s8, %s930_s13 }
  0x11   : > { %v602_v6 = vld [vmem:[%s432_s22] sm:$0xff] }
  0x17   : > { %v469_v3 = vld.sshfl [vmem:[#allocation1] sm:$0xff pattern:$0x75316420]  ;;  %v470_v4 = vld.sshfl [vmem:[#allocation1 + $0x8] sm:$0xff pattern:$0x75316420] }
  0x18   : > { %933 = vmatpush.msk.msra.mxu2 %vm478_vm0, %v469_v3  ;;  %934 = vmatpush.msk.msra.mxu3 %vm478_vm0, %v470_v4  ;;  %537 = vst [vmem:[#allocation1] ss:$2 sm:$0xff] %v535_v1 }
  0x19   : > { %909 = vmatmul.msk.f32.vlgmr.msra.gmra.mxu2 %vm471_vm1, %v465_v2  ;;  %912 = vmatmul.msk.f32.vlgmr.msra.gmra.mxu3 %vm471_vm1, %v465_v2 }
  0x1a   : > { %907 = vmatpush.msk.msra.mxu0 %vm478_vm0, %v469_v3  ;;  %910 = vmatpush.msk.msra.mxu1 %vm478_vm0, %v470_v4 }
  0x1b   : > { %908 = vmatmul.msk.f32.vlgmr.msra.gmra.mxu0 %vm471_vm1, %v464_v5  ;;  %911 = vmatmul.msk.f32.vlgmr.msra.gmra.mxu1 %vm471_vm1, %v464_v5 }
  0x1f   : > { %v538_v8 = vld.sshfl [vmem:[#allocation1] sm:$0xff pattern:$0x75316420]  ;;  %v539_v9 = vld.sshfl [vmem:[#allocation1 + $0x8] sm:$0xff pattern:$0x75316420] }
  0x20   : > { %913 = vmatpush.msk.msrb.mxu2 %vm478_vm0, %v538_v8  ;;  %916 = vmatpush.msk.msrb.mxu3 %vm478_vm0, %v539_v9  ;;  %604 = vst [vmem:[#allocation1] ss:$2 sm:$0xff] %v602_v6 }
  0x21   : > { %914 = vmatmul.msk.f32.vlgmr.msrb.gmra.mxu2 %vm471_vm1, %v533_v7  ;;  %917 = vmatmul.msk.f32.vlgmr.msrb.gmra.mxu3 %vm471_vm1, %v533_v7 }
  0x27   : > { %v605_v12 = vld.sshfl [vmem:[#allocation1] sm:$0xff pattern:$0x75316420]  ;;  %v606_v13 = vld.sshfl [vmem:[#allocation1 + $0x8] sm:$0xff pattern:$0x75316420] }
  0x28   : > { %919 = vmatpush.msk.msrb.mxu0 %vm478_vm0, %v605_v12  ;;  %922 = vmatpush.msk.msrb.mxu1 %vm478_vm0, %v606_v13 }
  0x29   : > { %920 = vmatmul.msk.f32.vlgmr.msrb.gmra.mxu0 %vm471_vm1, %v600_v10  ;;  %923 = vmatmul.msk.f32.vlgmr.msrb.gmra.mxu1 %vm471_vm1, %v600_v10 }
  0x2a   : > { %915 = vmatmul.msk.f32.gmra.mxu2 %vm471_vm1, %v534_v11  ;;  %918 = vmatmul.msk.f32.gmra.mxu3 %vm471_vm1, %v534_v11 }
  0x31   : > { %921 = vmatmul.msk.f32.gmra.mxu0 %vm471_vm1, %v601_v14  ;;  %924 = vmatmul.msk.f32.gmra.mxu1 %vm471_vm1, %v601_v14 }
  0x98   : > { %v500_v15 = vpop.f32.mrf.mxu0  ;;  %v523_v16 = vpop.f32.mrf.mxu1 }
  0x99   : > { %529 = vst [vmem:[%s442_s16] sm:$0xff] %v500_v15 }
  0x9a   : > { %530 = vst [vmem:[%s442_s16 + $0x8] sm:$0xff] %v523_v16 }
  0x9c   : > { %v503_v17 = vpop.f32.mrf.mxu2  ;;  %v526_v18 = vpop.f32.mrf.mxu3 }
  0x9d   : > { %531 = vst [vmem:[%s442_s16 + $0x10] sm:$0xff] %v503_v17 }
  0x9e   : > { %532 = vst [vmem:[%s442_s16 + $0x18] sm:$0xff] %v526_v18 }
  0xa4   : > { %v567_v19 = vpop.f32.mrf.mxu2  ;;  %v590_v20 = vpop.f32.mrf.mxu3 }
  0xa5   : > { %596 = vst [vmem:[%s452_s19] sm:$0xff] %v567_v19 }
  0xa6   : > { %597 = vst [vmem:[%s452_s19 + $0x8] sm:$0xff] %v590_v20  ;;  %v634_v21 = vpop.f32.mrf.mxu0  ;;  %v657_v22 = vpop.f32.mrf.mxu1 }
  0xa7   : > { %663 = vst [vmem:[%s462_s21] sm:$0xff] %v634_v21 }
  0xa8   : > { %664 = vst [vmem:[%s462_s21 + $0x8] sm:$0xff] %v657_v22 }
  0xad   : > { %v570_v23 = vpop.f32.mrf.mxu2  ;;  %v593_v24 = vpop.f32.mrf.mxu3 }
  0xae   : > { %598 = vst [vmem:[%s452_s19 + $0x10] sm:$0xff] %v570_v23  ;;  %v637_v25 = vpop.f32.mrf.mxu0  ;;  %v660_v26 = vpop.f32.mrf.mxu1 }
  0xaf   : > { %599 = vst [vmem:[%s452_s19 + $0x18] sm:$0xff] %v593_v24 }
  0xb0   : > { %665 = vst [vmem:[%s462_s21 + $0x10] sm:$0xff] %v637_v25 }
  0xb1   : > { %666 = vst [vmem:[%s462_s21 + $0x18] sm:$0xff] %v660_v26 }
  0xb2 PF: > { %s19_s29 = sadd.s32 1, %s981_s29   ;;  %s1124_s27 = smov %s977_s28 }
  0xb3   : > { %p16_p5 = scmp.ge.s32.totalorder %s19_s29, 4   ;;  %s1125_s28 = smov %s1127_s30 }
  0xb5   :  { %18 = sbr.rel (!%p16_p5) target bundleno = 2 (0x2), region = 104 }

</bundles_post_ra>
